<compile_context>
chip_gen: v7x
topology: tpu7x:2x2x1
jax: 0.10.0
libtpu: 0.0.40
codegen_flags: <defaults>
</compile_context>

<pallas_src>
import functools

import jax
import jax.numpy as jnp
from jax.experimental import pallas as pl
from jax.experimental.pallas import tpu as pltpu

LANES = 128      # padded logits width (must hold action_dim actor lanes + 1 value lane)
OUT_LANES = 8    # packed output slab: col0=logp, col1=value, col2=entropy, rest 0


def _round_up(x, m):
    return ((x + m - 1) // m) * m


def actor_critic_kernel(
    x_ref, act_ref,
    w1_ref, b1_ref, w2_ref, b2_ref, w3_ref, b3_ref,
    out_ref,
    *, action_dim,
):
    # ---- bf16 MXU passes, f32 accumulation, f32 elementwise math -------------
    x = x_ref[...].astype(jnp.bfloat16)                                # (TB, S)

    h1 = jnp.tanh(
        jnp.dot(x, w1_ref[...], preferred_element_type=jnp.float32) + b1_ref[...]
    )                                                                  # (TB, Hp2) f32

    h2 = jnp.tanh(
        jnp.dot(h1.astype(jnp.bfloat16), w2_ref[...],
                preferred_element_type=jnp.float32) + b2_ref[...]
    )                                                                  # (TB, Hp2) f32

    # cols [0, A): actor logits, col A: critic value, cols > A: exactly 0.
    out3 = (
        jnp.dot(h2.astype(jnp.bfloat16), w3_ref[...],
                preferred_element_type=jnp.float32) + b3_ref[...]
    )                                                                  # (TB, 128) f32

    tb = out3.shape[0]
    col = jax.lax.broadcasted_iota(jnp.int32, (tb, LANES), 1)
    valid = col < action_dim

    # numerically stable masked softmax statistics over the valid actor lanes
    neg_big = jnp.float32(-1e30)
    m = jnp.max(jnp.where(valid, out3, neg_big), axis=-1, keepdims=True)   # (TB, 1)
    e = jnp.where(valid, jnp.exp(out3 - m), 0.0)                           # (TB, 128)
    denom = jnp.sum(e, axis=-1, keepdims=True)                             # (TB, 1)
    log_denom = jnp.log(denom)

    # Categorical.log_prob(action): selected logit - logsumexp (one-hot select,
    # no dynamic gather on TPU)
    act = act_ref[...]                                                     # (TB, 1) i32
    sel = jnp.sum(jnp.where(col == act, out3, 0.0), axis=-1, keepdims=True)
    logp = sel - m - log_denom                                             # (TB, 1)

    # Categorical.entropy(): -sum p log p == m + log(denom) - E_p[logit]
    # (exact division; approx reciprocal biased this term previously)
    exp_logit = jnp.sum(e * out3, axis=-1, keepdims=True) / denom
    ent = m + log_denom - exp_logit                                        # (TB, 1)

    # critic value lives in column `action_dim` of the fused layer-3 output
    val = jnp.sum(jnp.where(col == action_dim, out3, 0.0),
                  axis=-1, keepdims=True)                                  # (TB, 1)

    # ---- narrow packed output slab: col0=logp, col1=value, col2=entropy ------
    col8 = jax.lax.broadcasted_iota(jnp.int32, (tb, OUT_LANES), 1)
    out_ref[...] = jnp.where(
        col8 == 0, logp,
        jnp.where(col8 == 1, val,
                  jnp.where(col8 == 2, ent, 0.0)))


def fuse_params(params, action_dim):
    """Fused / lane-padded weights. Weights returned in bf16, biases in f32."""
    w1a = params["w1a"]
    S, H = w1a.shape
    assert action_dim + 1 <= LANES, "action_dim must fit in one padded lane block"
    Hp2 = _round_up(2 * H, 128)        # lane-dense fused hidden width

    w1 = jnp.zeros((S, Hp2), jnp.float32)
    w1 = w1.at[:, :H].set(w1a).at[:, H:2 * H].set(params["w1v"])
    b1 = jnp.zeros((1, Hp2), jnp.float32)
    b1 = b1.at[:, :H].set(params["b1a"]).at[:, H:2 * H].set(params["b1v"])

    # block-diagonal layer 2 keeps the actor / critic heads independent
    # TODO(synk): for H >= ~128, split W2 into two (H,H) matmuls or use
    # pipeline_mode=pl.Buffered(1) on the resident weight specs to halve the
    # double-buffered weight VMEM footprint.
    w2 = jnp.zeros((Hp2, Hp2), jnp.float32)
    w2 = w2.at[:H, :H].set(params["w2a"]).at[H:2 * H, H:2 * H].set(params["w2v"])
    b2 = jnp.zeros((1, Hp2), jnp.float32)
    b2 = b2.at[:, :H].set(params["b2a"]).at[:, H:2 * H].set(params["b2v"])

    w3 = jnp.zeros((Hp2, LANES), jnp.float32)
    w3 = w3.at[:H, :action_dim].set(params["w3a"])
    w3 = w3.at[H:2 * H, action_dim:action_dim + 1].set(params["w3v"])
    b3 = jnp.zeros((1, LANES), jnp.float32)
    b3 = b3.at[:, :action_dim].set(params["b3a"])
    b3 = b3.at[:, action_dim:action_dim + 1].set(params["b3v"])

    # bf16 is MXU-native on v5e/v6e/v7x; post-matmul math stays f32 in-kernel.
    return (w1.astype(jnp.bfloat16), b1,
            w2.astype(jnp.bfloat16), b2,
            w3.astype(jnp.bfloat16), b3)


def actor_critic_evaluate(state, action, params, *, block_b=2048):
    """Pallas-backed equivalent of ActorCritic.evaluate(state, action)."""
    B, S = state.shape
    H = params["w1a"].shape[1]
    A = params["w3a"].shape[1]
    Hp2 = _round_up(2 * H, 128)

    w1, b1, w2, b2, w3, b3 = fuse_params(params, A)
    act2d = action.astype(jnp.int32).reshape(B, 1)

    # batch tile: multiple of 8 sublanes; cap at ceil(B/2) so grid >= 2 steps
    # (lets the "parallel" axis shard across both v7x TensorCores).
    if B <= 8:
        TB = B
    else:
        TB = min(block_b, B)
        TB = min(TB, -(-B // 2))
        TB = max(8, (TB // 8) * 8)
    grid = (pl.cdiv(B, TB),)

    kernel = functools.partial(actor_critic_kernel, action_dim=A)

    def resident(shape):
        # constant index_map -> weight stays in VMEM across all grid steps
        return pl.BlockSpec(shape, lambda i: (0,) * len(shape))

    # --- compiler params: explicit VMEM limit once the working set is large ---
    io_bytes = 2 * TB * (S * 4 + 4 + OUT_LANES * 4)          # double-buffered batch tiles
    wgt_bytes = 2 * 2 * (w1.size + w2.size + w3.size)        # bf16 weights, double-buffered
    bias_bytes = 2 * 4 * (b1.size + b2.size + b3.size)
    live_bytes = 6 * TB * max(Hp2, LANES) * 4                # f32 intermediates headroom
    vmem_estimate = int(1.25 * (io_bytes + wgt_bytes + bias_bytes + live_bytes))
    cp_kwargs = dict(dimension_semantics=("parallel",))      # shard batch over TCs
    if vmem_estimate > 16 * 1024 * 1024:                     # v5e default scoped limit
        cp_kwargs["vmem_limit_bytes"] = min(vmem_estimate, 128 * 1024 * 1024)

    flops = 2 * B * (S * Hp2 + Hp2 * Hp2 + Hp2 * LANES)
    transcendentals = B * (2 * Hp2 + LANES + 2)              # tanh + exp + log/div
    bytes_accessed = (4 * state.size + 4 * act2d.size
                      + 2 * (w1.size + w2.size + w3.size)
                      + 4 * (b1.size + b2.size + b3.size)
                      + 4 * B * OUT_LANES)

    out = pl.pallas_call(
        kernel,
        out_shape=jax.ShapeDtypeStruct((B, OUT_LANES), jnp.float32),
        grid_spec=pltpu.PrefetchScalarGridSpec(
            num_scalar_prefetch=0,
            grid=grid,
            in_specs=[
                pl.BlockSpec((TB, S), lambda i: (i, 0)),      # state (batch-blocked)
                pl.BlockSpec((TB, 1), lambda i: (i, 0)),      # action ids
                resident((S, Hp2)),                           # W1 fused (bf16)
                resident((1, Hp2)),                           # b1 fused (f32)
                resident((Hp2, Hp2)),                         # W2 block-diag (bf16)
                resident((1, Hp2)),                           # b2 fused (f32)
                resident((Hp2, LANES)),                       # W3 padded (bf16)
                resident((1, LANES)),                         # b3 padded (f32)
            ],
            out_specs=pl.BlockSpec((TB, OUT_LANES), lambda i: (i, 0)),
        ),
        compiler_params=pltpu.CompilerParams(**cp_kwargs),
        cost_estimate=pl.CostEstimate(
            flops=flops,
            transcendentals=transcendentals,
            bytes_accessed=bytes_accessed,
        ),
    )(state, act2d, w1, b1, w2, b2, w3, b3)

    # torch.squeeze(state_value) semantics -> (B,)
    return out[:, 0], out[:, 1], out[:, 2]


def init_params(key, state_dim, action_dim, n_latent_var):
    """PyTorch-style Linear init (uniform(-1/sqrt(in), 1/sqrt(in))).
    Weights stored transposed: (in, out); biases (1, out)."""
    def linear(k, fan_in, fan_out):
        kw, kb = jax.random.split(k)
        bound = 1.0 / jnp.sqrt(float(fan_in))
        w = jax.random.uniform(kw, (fan_in, fan_out), jnp.float32, -bound, bound)
        b = jax.random.uniform(kb, (1, fan_out), jnp.float32, -bound, bound)
        return w, b

    keys = jax.random.split(key, 6)
    w1a, b1a = linear(keys[0], state_dim, n_latent_var)
    w2a, b2a = linear(keys[1], n_latent_var, n_latent_var)
    w3a, b3a = linear(keys[2], n_latent_var, action_dim)
    w1v, b1v = linear(keys[3], state_dim, n_latent_var)
    w2v, b2v = linear(keys[4], n_latent_var, n_latent_var)
    w3v, b3v = linear(keys[5], n_latent_var, 1)
    return dict(w1a=w1a, b1a=b1a, w2a=w2a, b2a=b2a, w3a=w3a, b3a=b3a,
                w1v=w1v, b1v=b1v, w2v=w2v, b2v=b2v, w3v=w3v, b3v=b3v)


def _reference_evaluate(state, action, p):
    """Pure-JAX full-f32 reference (PyTorch-equivalent math)."""
    hp = jax.lax.Precision.HIGHEST
    h = jnp.tanh(jnp.dot(state, p["w1a"], precision=hp) + p["b1a"])
    h = jnp.tanh(jnp.dot(h, p["w2a"], precision=hp) + p["b2a"])
    logits = jnp.dot(h, p["w3a"], precision=hp) + p["b3a"]
    logp_all = jax.nn.log_softmax(logits, axis=-1)
    probs = jnp.exp(logp_all)
    logp = jnp.take_along_axis(logp_all, action[:, None].astype(jnp.int32),
                               axis=-1)[:, 0]
    ent = -jnp.sum(probs * logp_all, axis=-1)
    hv = jnp.tanh(jnp.dot(state, p["w1v"], precision=hp) + p["b1v"])
    hv = jnp.tanh(jnp.dot(hv, p["w2v"], precision=hp) + p["b2v"])
    val = (jnp.dot(hv, p["w3v"], precision=hp) + p["b3v"])[:, 0]
    return logp, val, ent


def _mirrored_reference(state, action, p):
    """Pure-JAX reference that mirrors the kernel's bf16 matmul-input casts
    exactly (weights + pre-dot activations rounded to bf16, f32 accumulation)."""
    hp = jax.lax.Precision.HIGHEST
    c = lambda a: a.astype(jnp.bfloat16).astype(jnp.float32)
    x = c(state)
    h = jnp.tanh(jnp.dot(x, c(p["w1a"]), precision=hp) + p["b1a"])
    h = jnp.tanh(jnp.dot(c(h), c(p["w2a"]), precision=hp) + p["b2a"])
    logits = jnp.dot(c(h), c(p["w3a"]), precision=hp) + p["b3a"]
    logp_all = jax.nn.log_softmax(logits, axis=-1)
    probs = jnp.exp(logp_all)
    logp = jnp.take_along_axis(logp_all, action[:, None].astype(jnp.int32),
                               axis=-1)[:, 0]
    ent = -jnp.sum(probs * logp_all, axis=-1)
    hv = jnp.tanh(jnp.dot(x, c(p["w1v"]), precision=hp) + p["b1v"])
    hv = jnp.tanh(jnp.dot(c(hv), c(p["w2v"]), precision=hp) + p["b2v"])
    val = (jnp.dot(c(hv), c(p["w3v"]), precision=hp) + p["b3v"])[:, 0]
    return logp, val, ent


if __name__ == "__main__":
    # Small shapes consistent with the module; B=16 with the ceil(B/2) tile cap
    # gives a 2-step batch grid (exercises multi-step grid / dual-TC sharding).
    B, STATE_DIM, ACTION_DIM, N_LATENT = 16, 16, 4, 32

    key = jax.random.PRNGKey(0)
    k_state, k_act, k_params = jax.random.split(key, 3)

    state = jax.random.normal(k_state, (B, STATE_DIM), dtype=jnp.float32)
    action = jax.random.randint(k_act, (B,), 0, ACTION_DIM, dtype=jnp.int32)
    params = init_params(k_params, STATE_DIM, ACTION_DIM, N_LATENT)

    logp, value, entropy = actor_critic_evaluate(state, action, params)
    jax.block_until_ready((logp, value, entropy))

    # 1) Kernel correctness: compare against a reference that mirrors the
    #    kernel's bf16 matmul-input casts -> should agree to f32 precision.
    m_logp, m_val, m_ent = _mirrored_reference(state, action, params)
    assert jnp.allclose(logp, m_logp, atol=1e-3), "logprob mismatch (mirrored)"
    assert jnp.allclose(value, m_val, atol=1e-3), "value mismatch (mirrored)"
    assert jnp.allclose(entropy, m_ent, atol=1e-3), "entropy mismatch (mirrored)"

    # 2) Semantic sanity vs. the full-f32 PyTorch-equivalent math: bf16 MXU
    #    inputs introduce ~1e-2-scale approximation on this tanh net.
    r_logp, r_val, r_ent = _reference_evaluate(state, action, params)
    assert jnp.allclose(logp, r_logp, atol=1e-1), "logprob mismatch (f32 ref)"
    assert jnp.allclose(value, r_val, atol=1e-1), "value mismatch (f32 ref)"
    assert jnp.allclose(entropy, r_ent, atol=1e-1), "entropy mismatch (f32 ref)"

    # TODO(synk): ActorCritic.act() (Categorical sampling + memory bookkeeping)
    # is host-side control flow and is not implemented as a kernel.

    print("KERNEL_OK")
</pallas_src>

<mosaic_0001>
module attributes {stable_mosaic.version = 11 : i64} {
  func.func @actor_critic_kernel(%arg0: i32, %arg1: memref<8x16xf32, #tpu.memory_space<vmem>>, %arg2: memref<8x1xi32, #tpu.memory_space<vmem>>, %arg3: memref<16x128xbf16, #tpu.memory_space<vmem>>, %arg4: memref<1x128xf32, #tpu.memory_space<vmem>>, %arg5: memref<128x128xbf16, #tpu.memory_space<vmem>>, %arg6: memref<1x128xf32, #tpu.memory_space<vmem>>, %arg7: memref<128x128xbf16, #tpu.memory_space<vmem>>, %arg8: memref<1x128xf32, #tpu.memory_space<vmem>>, %arg9: memref<8x8xf32, #tpu.memory_space<vmem>>) attributes {dimension_semantics = [#tpu.dimension_semantics<parallel>], iteration_bounds = array<i64: 2>, scalar_prefetch = 0 : i64, scratch_operands = 0 : i64, tpu.core_type = #tpu.core_type<tc>, window_params = [{transform_indices = @transform_0, window_bounds = array<i64: 8, 16>}, {transform_indices = @transform_1, window_bounds = array<i64: 8, 1>}, {pipeline_mode = #tpu.pipeline_mode<synchronous>, transform_indices = @transform_2, window_bounds = array<i64: 16, 128>}, {pipeline_mode = #tpu.pipeline_mode<synchronous>, transform_indices = @transform_3, window_bounds = array<i64: 1, 128>}, {pipeline_mode = #tpu.pipeline_mode<synchronous>, transform_indices = @transform_4, window_bounds = array<i64: 128, 128>}, {pipeline_mode = #tpu.pipeline_mode<synchronous>, transform_indices = @transform_5, window_bounds = array<i64: 1, 128>}, {pipeline_mode = #tpu.pipeline_mode<synchronous>, transform_indices = @transform_6, window_bounds = array<i64: 128, 128>}, {pipeline_mode = #tpu.pipeline_mode<synchronous>, transform_indices = @transform_7, window_bounds = array<i64: 1, 128>}, {transform_indices = @transform_8, window_bounds = array<i64: 8, 8>}]} {
    %c0 = arith.constant 0 : index
    %c0_0 = arith.constant 0 : index
    %0 = vector.load %arg1[%c0, %c0_0] : memref<8x16xf32, #tpu.memory_space<vmem>>, vector<8x16xf32>
    %1 = arith.truncf %0 : vector<8x16xf32> to vector<8x16xbf16>
    %c0_1 = arith.constant 0 : index
    %c0_2 = arith.constant 0 : index
    %2 = vector.load %arg3[%c0_1, %c0_2] : memref<16x128xbf16, #tpu.memory_space<vmem>>, vector<16x128xbf16>
    %cst = arith.constant dense<0.000000e+00> : vector<8x128xf32>
    %3 = tpu.matmul %1, %2, %cst {dimension_numbers = #tpu.dot_dimension_numbers<[1], [0], [0], [1], [0, 0, 1, 1], [], []>} : vector<8x16xbf16>, vector<16x128xbf16>, vector<8x128xf32> -> vector<8x128xf32>
    %c0_3 = arith.constant 0 : index
    %c0_4 = arith.constant 0 : index
    %4 = vector.load %arg4[%c0_3, %c0_4] : memref<1x128xf32, #tpu.memory_space<vmem>>, vector<1x128xf32>
    %5 = vector.broadcast %4 : vector<1x128xf32> to vector<8x128xf32>
    %6 = arith.addf %3, %5 : vector<8x128xf32>
    %7 = math.tanh %6 : vector<8x128xf32>
    %8 = arith.truncf %7 : vector<8x128xf32> to vector<8x128xbf16>
    %c0_5 = arith.constant 0 : index
    %c0_6 = arith.constant 0 : index
    %9 = vector.load %arg5[%c0_5, %c0_6] : memref<128x128xbf16, #tpu.memory_space<vmem>>, vector<128x128xbf16>
    %cst_7 = arith.constant dense<0.000000e+00> : vector<8x128xf32>
    %10 = tpu.matmul %8, %9, %cst_7 {dimension_numbers = #tpu.dot_dimension_numbers<[1], [0], [0], [1], [0, 0, 1, 1], [], []>} : vector<8x128xbf16>, vector<128x128xbf16>, vector<8x128xf32> -> vector<8x128xf32>
    %c0_8 = arith.constant 0 : index
    %c0_9 = arith.constant 0 : index
    %11 = vector.load %arg6[%c0_8, %c0_9] : memref<1x128xf32, #tpu.memory_space<vmem>>, vector<1x128xf32>
    %12 = vector.broadcast %11 : vector<1x128xf32> to vector<8x128xf32>
    %13 = arith.addf %10, %12 : vector<8x128xf32>
    %14 = math.tanh %13 : vector<8x128xf32>
    %15 = arith.truncf %14 : vector<8x128xf32> to vector<8x128xbf16>
    %c0_10 = arith.constant 0 : index
    %c0_11 = arith.constant 0 : index
    %16 = vector.load %arg7[%c0_10, %c0_11] : memref<128x128xbf16, #tpu.memory_space<vmem>>, vector<128x128xbf16>
    %cst_12 = arith.constant dense<0.000000e+00> : vector<8x128xf32>
    %17 = tpu.matmul %15, %16, %cst_12 {dimension_numbers = #tpu.dot_dimension_numbers<[1], [0], [0], [1], [0, 0, 1, 1], [], []>} : vector<8x128xbf16>, vector<128x128xbf16>, vector<8x128xf32> -> vector<8x128xf32>
    %c0_13 = arith.constant 0 : index
    %c0_14 = arith.constant 0 : index
    %18 = vector.load %arg8[%c0_13, %c0_14] : memref<1x128xf32, #tpu.memory_space<vmem>>, vector<1x128xf32>
    %19 = vector.broadcast %18 : vector<1x128xf32> to vector<8x128xf32>
    %20 = arith.addf %17, %19 : vector<8x128xf32>
    %21 = tpu.iota {dimensions = array<i32: 1>} : vector<8x128xi32>
    %c4_i32 = arith.constant 4 : i32
    %22 = vector.broadcast %c4_i32 : i32 to vector<8x128xi32>
    %23 = arith.cmpi slt, %21, %22 : vector<8x128xi32>
    %cst_15 = arith.constant -1.000000e+30 : f32
    %24 = vector.broadcast %cst_15 : f32 to vector<8x128xf32>
    %25 = arith.select %23, %20, %24 : vector<8x128xi1>, vector<8x128xf32>
    %cst_16 = arith.constant dense<0xFF800000> : vector<8xf32>
    %26 = vector.multi_reduction <maximumf>, %25, %cst_16 [1] : vector<8x128xf32> to vector<8xf32>
    %27 = vector.shape_cast %26 : vector<8xf32> to vector<8x1xf32>
    %28 = vector.broadcast %27 : vector<8x1xf32> to vector<8x128xf32>
    %29 = arith.subf %20, %28 : vector<8x128xf32>
    %30 = math.exp %29 : vector<8x128xf32>
    %cst_17 = arith.constant 0.000000e+00 : f32
    %31 = vector.broadcast %cst_17 : f32 to vector<8x128xf32>
    %32 = arith.select %23, %30, %31 : vector<8x128xi1>, vector<8x128xf32>
    %cst_18 = arith.constant dense<0.000000e+00> : vector<8xf32>
    %33 = vector.multi_reduction <add>, %32, %cst_18 [1] : vector<8x128xf32> to vector<8xf32>
    %34 = vector.shape_cast %33 : vector<8xf32> to vector<8x1xf32>
    %35 = math.log %34 : vector<8x1xf32>
    %c0_19 = arith.constant 0 : index
    %c0_20 = arith.constant 0 : index
    %36 = vector.load %arg2[%c0_19, %c0_20] : memref<8x1xi32, #tpu.memory_space<vmem>>, vector<8x1xi32>
    %37 = vector.broadcast %36 : vector<8x1xi32> to vector<8x128xi32>
    %38 = arith.cmpi eq, %21, %37 : vector<8x128xi32>
    %cst_21 = arith.constant 0.000000e+00 : f32
    %39 = vector.broadcast %cst_21 : f32 to vector<8x128xf32>
    %40 = arith.select %38, %20, %39 : vector<8x128xi1>, vector<8x128xf32>
    %cst_22 = arith.constant dense<0.000000e+00> : vector<8xf32>
    %41 = vector.multi_reduction <add>, %40, %cst_22 [1] : vector<8x128xf32> to vector<8xf32>
    %42 = vector.shape_cast %41 : vector<8xf32> to vector<8x1xf32>
    %43 = arith.subf %42, %27 : vector<8x1xf32>
    %44 = arith.subf %43, %35 : vector<8x1xf32>
    %45 = arith.mulf %32, %20 : vector<8x128xf32>
    %cst_23 = arith.constant dense<0.000000e+00> : vector<8xf32>
    %46 = vector.multi_reduction <add>, %45, %cst_23 [1] : vector<8x128xf32> to vector<8xf32>
    %47 = vector.shape_cast %46 : vector<8xf32> to vector<8x1xf32>
    %48 = arith.divf %47, %34 : vector<8x1xf32>
    %49 = arith.addf %27, %35 : vector<8x1xf32>
    %50 = arith.subf %49, %48 : vector<8x1xf32>
    %c4_i32_24 = arith.constant 4 : i32
    %51 = vector.broadcast %c4_i32_24 : i32 to vector<8x128xi32>
    %52 = arith.cmpi eq, %21, %51 : vector<8x128xi32>
    %cst_25 = arith.constant 0.000000e+00 : f32
    %53 = vector.broadcast %cst_25 : f32 to vector<8x128xf32>
    %54 = arith.select %52, %20, %53 : vector<8x128xi1>, vector<8x128xf32>
    %cst_26 = arith.constant dense<0.000000e+00> : vector<8xf32>
    %55 = vector.multi_reduction <add>, %54, %cst_26 [1] : vector<8x128xf32> to vector<8xf32>
    %56 = vector.shape_cast %55 : vector<8xf32> to vector<8x1xf32>
    %57 = tpu.iota {dimensions = array<i32: 1>} : vector<8x8xi32>
    %c0_i32 = arith.constant 0 : i32
    %58 = vector.broadcast %c0_i32 : i32 to vector<8x8xi32>
    %59 = arith.cmpi eq, %57, %58 : vector<8x8xi32>
    %c1_i32 = arith.constant 1 : i32
    %60 = vector.broadcast %c1_i32 : i32 to vector<8x8xi32>
    %61 = arith.cmpi eq, %57, %60 : vector<8x8xi32>
    %c2_i32 = arith.constant 2 : i32
    %62 = vector.broadcast %c2_i32 : i32 to vector<8x8xi32>
    %63 = arith.cmpi eq, %57, %62 : vector<8x8xi32>
    %cst_27 = arith.constant 0.000000e+00 : f32
    %64 = vector.shape_cast %50 : vector<8x1xf32> to vector<8x1xf32>
    %65 = vector.broadcast %64 : vector<8x1xf32> to vector<8x8xf32>
    %66 = vector.broadcast %cst_27 : f32 to vector<8x8xf32>
    %67 = arith.select %63, %65, %66 : vector<8x8xi1>, vector<8x8xf32>
    %68 = vector.shape_cast %56 : vector<8x1xf32> to vector<8x1xf32>
    %69 = vector.broadcast %68 : vector<8x1xf32> to vector<8x8xf32>
    %70 = arith.select %61, %69, %67 : vector<8x8xi1>, vector<8x8xf32>
    %71 = vector.shape_cast %44 : vector<8x1xf32> to vector<8x1xf32>
    %72 = vector.broadcast %71 : vector<8x1xf32> to vector<8x8xf32>
    %73 = arith.select %59, %72, %70 : vector<8x8xi1>, vector<8x8xf32>
    %c0_28 = arith.constant 0 : index
    %c0_29 = arith.constant 0 : index
    %74 = vector.load %arg9[%c0_28, %c0_29] : memref<8x8xf32, #tpu.memory_space<vmem>>, vector<8x8xf32>
    tpu.vector_store %arg9[%c0_28, %c0_29], %73 {strides = array<i32>} : memref<8x8xf32, #tpu.memory_space<vmem>>, vector<8x8xf32>,
    return
  }
  func.func @transform_0(%arg0: i32) -> (i32, i32) {
    %c0_i32 = arith.constant 0 : i32
    %c0_i32_0 = arith.constant 0 : i32
    return %arg0, %c0_i32 : i32, i32
  }
  func.func @transform_1(%arg0: i32) -> (i32, i32) {
    %c0_i32 = arith.constant 0 : i32
    %c0_i32_0 = arith.constant 0 : i32
    return %arg0, %c0_i32 : i32, i32
  }
  func.func @transform_2(%arg0: i32) -> (i32, i32) {
    %c0_i32 = arith.constant 0 : i32
    %c0_i32_0 = arith.constant 0 : i32
    %c0_i32_1 = arith.constant 0 : i32
    return %c0_i32, %c0_i32_0 : i32, i32
  }
  func.func @transform_3(%arg0: i32) -> (i32, i32) {
    %c0_i32 = arith.constant 0 : i32
    %c0_i32_0 = arith.constant 0 : i32
    %c0_i32_1 = arith.constant 0 : i32
    return %c0_i32, %c0_i32_0 : i32, i32
  }
  func.func @transform_4(%arg0: i32) -> (i32, i32) {
    %c0_i32 = arith.constant 0 : i32
    %c0_i32_0 = arith.constant 0 : i32
    %c0_i32_1 = arith.constant 0 : i32
    return %c0_i32, %c0_i32_0 : i32, i32
  }
  func.func @transform_5(%arg0: i32) -> (i32, i32) {
    %c0_i32 = arith.constant 0 : i32
    %c0_i32_0 = arith.constant 0 : i32
    %c0_i32_1 = arith.constant 0 : i32
    return %c0_i32, %c0_i32_0 : i32, i32
  }
  func.func @transform_6(%arg0: i32) -> (i32, i32) {
    %c0_i32 = arith.constant 0 : i32
    %c0_i32_0 = arith.constant 0 : i32
    %c0_i32_1 = arith.constant 0 : i32
    return %c0_i32, %c0_i32_0 : i32, i32
  }
  func.func @transform_7(%arg0: i32) -> (i32, i32) {
    %c0_i32 = arith.constant 0 : i32
    %c0_i32_0 = arith.constant 0 : i32
    %c0_i32_1 = arith.constant 0 : i32
    return %c0_i32, %c0_i32_0 : i32, i32
  }
  func.func @transform_8(%arg0: i32) -> (i32, i32) {
    %c0_i32 = arith.constant 0 : i32
    %c0_i32_0 = arith.constant 0 : i32
    return %arg0, %c0_i32 : i32, i32
  }
}

</mosaic_0001>

<bundles_post_ra>
// kernel: tpu_custom_call.1
= control target key start
LH: loop header
LB: loop body
LE: loop exit
PB: predicated region body
PF: predicated region fallthrough
CT: control target
= control target key end

     0   :  { %13 = vsyncpa [#allocation3], 0  ;;  %s1189_s0 = inlined_call_operand.vmem [shape: f32[16,16], index: 0, kind: input, shape index: {}]   ;;  %s1190_s1 = inlined_call_operand.vmem [shape: s32[16,1], index: 1, kind: input, shape index: {}]   ;;  %s1191_s2 = inlined_call_operand.vmem [shape: bf16[16,128], index: 2, kind: input, shape index: {}]   ;;  %s1192_s3 = inlined_call_operand.vmem [shape: f32[1,128], index: 3, kind: input, shape index: {}]   ;;  %s1193_s4 = inlined_call_operand.hbm [shape: bf16[128,128], index: 4, kind: input, shape index: {}]   ;;  %s1194_s5 = inlined_call_operand.vmem [shape: f32[1,128], index: 5, kind: input, shape index: {}]   ;;  %s1195_s6 = inlined_call_operand.hbm [shape: bf16[128,128], index: 6, kind: input, shape index: {}]   ;;  %s1196_s7 = inlined_call_operand.vmem [shape: f32[1,128], index: 7, kind: input, shape index: {}]   ;;  %s1197_s8 = inlined_call_operand.vmem [shape: f32[16,8], index: 8, kind: output, shape index: {}]  }
   0x1   :  { %14 = vsyncpa [#allocation5], 0  ;;  %s1053_s27 = smov 0  }
   0x2 LB: > { %s1059_s28 = sadd.s32 4294967295, %s999_s27   ;;  %p768_p0 = scmp.ge.s32.totalorder %s999_s27, 1  ;;  %s999_s27 = sphi %s1053_s27, %s20_s27  }
   0x3   : > { %p229_p1 = scmp.lt.s32.totalorder %s999_s27, 3  ;;  %s1001_s29 = smov [#allocation2]  }
   0x4   : > { %s247_s30 = sshll.u32 %s1001_s29, 4  ;;  %p1198_p3 = scmp.eq.s32.totalorder %s1059_s28, 0  ;;  %s248_s30 = int_to_ptr.vmem [resolvable:$true] %s247_s30 }
   0x5   : > { %p1063_p2 = pnand %p768_p0, %p229_p1  ;;  %s1002_s10 = smov [#allocation4]  }
   0x6   : > { %s263_s11 = sshll.u32 %s1002_s10, 4  ;;  %s929_s15 = scalar_lea.hbm %s1193_s4, 1024  ;;  %s1076_s11 = int_to_ptr.vmem [resolvable:$true] %s263_s11 }
   0x7   : > { %s1200_s9 = scalar_select %p1063_p2, 1, 0 }
   0x8   : > { %p875_p4 = pneg %p1063_p2  ;;  %p930_p6 = scmp.ne.s32.totalorder %s1193_s4, %s929_s15 }
   0x9   : > { %p936_p10 = scmp.lt.u32.totalorder %s929_s15, %s1193_s4 }
   0xa   : > { %p1072_p5 = pnand %p1198_p3, %p875_p4 }
   0xc   : > { %p931_p7 = pneg %p1072_p5 }
   0xe   : > { %p932_p8 = pnand %p931_p7, %p930_p6 }
  0x10   : > { %p933_p9 = pneg %p932_p8 }
  0x12   : > { %p938_p11 = pnand %p936_p10, %p933_p9 }
  0x14   : > { %941 = shalt.err (!%p938_p11)
}
  0x15   : > { %s942_s20 = scalar_lea.vmem %s248_s30, 1024  ;;  %p950_p1 = scmp.lt.s32.totalorder %s248_s30, %s248_s30 }
  0x16   : > { %p943_p12 = scmp.ne.s32.totalorder %s248_s30, %s942_s20  ;;  %p951_p4 = scmp.lt.s32.totalorder %s942_s20, %s942_s20 }
  0x18   : > { %p945_p13 = pnand %p943_p12, %p931_p7  ;;  %p952_p3 = por %p951_p4, %p950_p1 }
  0x1a   : > { %p946_p0 = pneg %p945_p13 }
  0x1c   : > { %p953_p2 = pnand %p952_p3, %p946_p0 }
  0x1e   : > { %956 = shalt.err (!%p953_p2)
}
  0x1f   : > { %s1003_s21 = smov 64   ;;  %s1004_s22 = smov 4  }
  0x20   : > { %878 = dma.hbm_to_vmem [thread:$0]  (!%p1072_p5), %s1193_s4, 1024, %s248_s30, [#allocation3], %s1003_s21, %s1003_s21, %s1004_s22  }
  0x21   : > { %s957_s29 = scalar_lea.hbm %s1195_s6, 1024 }
  0x22   : > { %p958_p6 = scmp.ne.s32.totalorder %s1195_s6, %s957_s29  ;;  %p964_p8 = scmp.lt.u32.totalorder %s957_s29, %s1195_s6 }
  0x24   : > { %p960_p2 = pnand %p958_p6, %p931_p7 }
  0x26   : > { %p961_p3 = pneg %p960_p2 }
  0x28   : > { %p966_p9 = pnand %p964_p8, %p961_p3 }
  0x2a   : > { %969 = shalt.err (!%p966_p9)
}
  0x2b   : > { %s970_s30 = scalar_lea.vmem %s1076_s11, 1024  ;;  %p978_p13 = scmp.lt.s32.totalorder %s1076_s11, %s1076_s11 }
  0x2c   : > { %p971_p10 = scmp.ne.s32.totalorder %s1076_s11, %s970_s30  ;;  %p979_p0 = scmp.lt.s32.totalorder %s970_s30, %s970_s30 }
  0x2e   : > { %p973_p11 = pnand %p971_p10, %p931_p7  ;;  %p980_p1 = por %p979_p0, %p978_p13 }
  0x30   : > { %p974_p12 = pneg %p973_p11 }
  0x32   : > { %p981_p4 = pnand %p980_p1, %p974_p12 }
  0x34   : > { %984 = shalt.err (!%p981_p4)
}
  0x35   : > { %881 = dma.hbm_to_vmem [thread:$0]  (!%p1072_p5), %s1195_s6, 1024, %s1076_s11, [#allocation5], %s1003_s21, %s1003_s21, %s1004_s22  }
  0x36   : > { %p1202_p6 = scmp.ne.s32.totalorder %s1200_s9, 0 }
  0x37   : > { %p1203_p2 = scmp.eq.s32.totalorder (!%p1202_p6), %s1059_s28, 0 }
  0x38   : > { %296 = sbr.rel (%p1202_p6) target bundleno = 1065 (0x429), region = 52 }
  0x3f   : > { %990 = dma.done.wait (%p1203_p2), [#allocation3], 1024   ;;  %p1204_p7 = pmov %p1203_p2 }
  0x40   : > { %p1205_p3 = pmov %p1203_p2 }
  0x41   : > { %992 = vsyncadd (%p1204_p7), [#allocation3], 4294966272 }
  0x42   : > { %994 = dma.done.wait (%p1205_p3), [#allocation5], 1024   ;;  %p1206_p8 = pmov %p1203_p2 }
  0x43   : > { %p336_p9 = scmp.lt.s32.totalorder %s1059_s28, 1  ;;  %v1005_v0 = vmov 0.0   ;;  %vm1006_vm0 = vmmov 0   ;;  %v902_v1 = vld [vmem:[%s1191_s2] sm:$0xff]   ;;  %vm366_vm1 = vcmask 130048   ;;  %v904_v5 = vld [vmem:[#allocation2 + $0x8] sm:$0xff]   ;;  %v636_v37 = vlaneseq }
  0x44   : > { %996 = vsyncadd (%p1206_p8), [#allocation5], 4294966272  ;;  %821 = vmatprep.subr.bf16.mxu0 %v1005_v0  ;;  %823 = vmatprep.mubr.msk.bf16.mxu0 %vm1006_vm0, %v1005_v0  ;;  %v903_v4 = vld [vmem:[#allocation2] sm:$0xff]   ;;  %v905_v6 = vld [vmem:[#allocation2 + $0x10] sm:$0xff]   ;;  %v1007_v36 = vmov 0   ;;  %vm677_vm8 = vcmask 64512  }
  0x45   : > { %s1208_s28 = smov (!%p336_p9, %s1059_s28), 1  ;;  %827 = vmatprep.subr.bf16.mxu1 %v1005_v0  ;;  %843 = vmatprep.mubr.msk.bf16.mxu1 %vm1006_vm0, %v1005_v0  ;;  %v906_v7 = vld [vmem:[#allocation2 + $0x18] sm:$0xff]   ;;  %v907_v8 = vld [vmem:[#allocation2 + $0x20] sm:$0xff]   ;;  %v908_v9 = vld [vmem:[#allocation2 + $0x28] sm:$0xff]   ;;  %v637_v38 = vand.u32 127, %v636_v37 }
  0x46   : > { %s1143_s9 = sshll.u32 %s1208_s28, 3  ;;  %822 = vmatpush3.bf16.msra.mxu0 %v902_v1  ;;  %828 = vmatpush3.bf16.msra.mxu1 %v903_v4  ;;  %v909_v10 = vld [vmem:[#allocation2 + $0x30] sm:$0xff]   ;;  %v910_v11 = vld [vmem:[#allocation2 + $0x38] sm:$0xff]   ;;  %v911_v12 = vld [vmem:[#allocation4] sm:$0xff]  }
  0x47   : > { %s339_s18 = scalar_lea.vmem %s1189_s0, %s1143_s9  ;;  %847 = vmatprep.subr.bf16.mxu0 %v1005_v0  ;;  %829 = vmatprep.subr.bf16.mxu1 %v1005_v0  ;;  %v912_v13 = vld [vmem:[#allocation4 + $0x8] sm:$0xff]   ;;  %v913_v14 = vld [vmem:[#allocation4 + $0x10] sm:$0xff]   ;;  %v914_v15 = vld [vmem:[#allocation4 + $0x18] sm:$0xff]   ;;  %vm638_vm2 = vcmp.lt.s32.totalorder %v637_v38, 4  ;;  %s343_s10 = scalar_lea.vmem %s1190_s1, %s1143_s9  ;;  %vm667_vm4 = vcmp.eq.s32.totalorder %v637_v38, 4  ;;  %vm673_vm5 = vcmp.eq.s32.totalorder %v637_v38, 2 }
  0x48   : > { %v349_v2 = vld [vmem:[%s339_s18] sm:$0xff]  ;;  %v916_v25 = vld [vmem:[#allocation4 + $0x28] sm:$0xff]   ;;  %v917_v26 = vld [vmem:[#allocation4 + $0x30] sm:$0xff]   ;;  %901 = vset.pattern.permute.xlu0 %v1007_v36  ;;  %vm672_vm6 = vcmp.eq.s32.totalorder %v637_v38, 1  ;;  %vm671_vm7 = vcmp.eq.s32.totalorder %v637_v38, 0  ;;  %s347_s15 = scalar_lea.vmem %s1197_s8, %s1143_s9 }
  0x49   : > { %v350_v3 = vpack.c.bf16 %v349_v2, %v349_v2  ;;  %v778_v16 = vld [vmem:[%s1192_s3] ss:$0 sm:$0xff]  ;;  %v918_v27 = vld [vmem:[#allocation4 + $0x38] sm:$0xff]  }
  0x4a   : > { %830 = vmatpush3.bf16.msra.mxu1 %v904_v5  ;;  %v915_v24 = vld [vmem:[#allocation4 + $0x20] sm:$0xff]  }
  0x4b   : > { %824 = vmatmul.mubr.msk.bf16.vlgmr.msra.gmra.mrb[0].mxu0 %vm366_vm1, %v350_v3  ;;  %831 = vmatprep.subr.bf16.mxu1 %v1005_v0  ;;  %v781_v28 = vld [vmem:[%s1194_s5] ss:$0 sm:$0xff] }
  0x4c   : > { %863 = vmatprep.mubr.msk.bf16.mxu0 %vm1006_vm0, %v1005_v0  ;;  %848 = vmatpush3.bf16.msra.mxu0 %v911_v12  ;;  %v790_v39 = vld [vmem:[%s1196_s7] ss:$0 sm:$0xff] }
  0x4d   : > { %849 = vmatprep.subr.bf16.mxu0 %v1005_v0  ;;  %v650_v46 = vld [vmem:[%s343_s10] sm:$0xff] }
  0x4e   : > { %832 = vmatpush3.bf16.msra.mxu1 %v905_v6 }
  0x4f   : > { %833 = vmatprep.subr.bf16.mxu1 %v1005_v0 }
  0x50   : > { %850 = vmatpush3.bf16.msra.mxu0 %v912_v13 }
  0x51   : > { %851 = vmatprep.subr.bf16.mxu0 %v1005_v0 }
  0x52   : > { %834 = vmatpush3.bf16.msra.mxu1 %v906_v7 }
  0x53   : > { %835 = vmatprep.subr.bf16.mxu1 %v1005_v0 }
  0x54   : > { %852 = vmatpush3.bf16.msra.mxu0 %v913_v14 }
  0x55   : > { %853 = vmatprep.subr.bf16.mxu0 %v1005_v0 }
  0x56   : > { %836 = vmatpush3.bf16.msra.mxu1 %v907_v8 }
  0x57   : > { %837 = vmatprep.subr.bf16.mxu1 %v1005_v0 }
  0x58   : > { %854 = vmatpush3.bf16.msra.mxu0 %v914_v15 }
  0x59   : > { %855 = vmatprep.subr.bf16.mxu0 %v1005_v0 }
  0x5a   : > { %838 = vmatpush3.bf16.msra.mxu1 %v908_v9 }
  0x5b   : > { %839 = vmatprep.subr.bf16.mxu1 %v1005_v0 }
  0x5c   : > { %856 = vmatpush3.bf16.msra.mxu0 %v915_v24 }
  0x5d   : > { %857 = vmatprep.subr.bf16.mxu0 %v1005_v0 }
  0x5e   : > { %840 = vmatpush3.bf16.msra.mxu1 %v909_v10 }
  0x5f   : > { %841 = vmatprep.subr.bf16.mxu1 %v1005_v0 }
  0x60   : > { %858 = vmatpush3.bf16.msra.mxu0 %v916_v25 }
  0x61   : > { %859 = vmatprep.subr.bf16.mxu0 %v1005_v0 }
  0x62   : > { %842 = vmatpush3.bf16.msra.mxu1 %v910_v11 }
  0x64   : > { %860 = vmatpush3.bf16.msra.mxu0 %v917_v26 }
  0x65   : > { %861 = vmatprep.subr.bf16.mxu0 %v1005_v0 }
  0x68   : > { %862 = vmatpush3.bf16.msra.mxu0 %v918_v27 }
 0x11e   : > { %v404_v17 = vpop.f32.mrb[0].mxu0 }
 0x11f   : > { %v405_v18 = vadd.f32 %v778_v16, %v404_v17  ;;  %v825_v19 = vpop.f32.mrb[1].mxu0 }
 0x120   : > { %v407_v20 = vpop.f32.mrb[2].mxu0 }
 0x121   : > { %919 = vtanh.f32 %v405_v18  ;;  %v826_v21 = vpop.f32.mrb[3].mxu0 }
 0x12b   : > { %v920_v22 = vpop.eup %919 }
 0x12c   : > { %v411_v23 = vpack.c.bf16 %v920_v22, %v920_v22 }
 0x12e   : > { %844 = vmatmul.mubr.bf16.vlgmr.msra.gmra.mrb[0].mxu1 %v411_v23 }
 0x201   : > { %v517_v29 = vpop.f32.mrb[0].mxu1 }
 0x202   : > { %v518_v30 = vadd.f32 %v781_v28, %v517_v29  ;;  %v845_v31 = vpop.f32.mrb[1].mxu1 }
 0x203   : > { %v520_v32 = vpop.f32.mrb[2].mxu1 }
 0x204   : > { %921 = vtanh.f32 %v518_v30  ;;  %v846_v33 = vpop.f32.mrb[3].mxu1 }
 0x20e   : > { %v922_v34 = vpop.eup %921 }
 0x20f   : > { %v524_v35 = vpack.c.bf16 %v922_v34, %v922_v34 }
 0x211   : > { %864 = vmatmul.mubr.bf16.vlgmr.msra.gmra.mrb[4].mxu0 %v524_v35 }
 0x2e4   : > { %v630_v40 = vpop.f32.mrb[4].mxu0 }
 0x2e5   : > { %v631_v41 = vadd.f32 %v790_v39, %v630_v40  ;;  %v865_v42 = vpop.f32.mrb[5].mxu0 }
 0x2e6   : > { %v633_v43 = vpop.f32.mrb[6].mxu0 }
 0x2e7   : > { %v866_v44 = vpop.f32.mrb[7].mxu0  ;;  %v639_v45 = vsel %vm638_vm2, %v631_v41, -1e+30  ;;  %v668_v55 = vsel %vm667_vm4, %v631_v41, 0.0 }
 0x2e8   : > { %640 = vmax.xlane.f32.xlu0 %v639_v45 }
 0x2fe   : > { %652 = vperm.xlu0 %901, %v650_v46  }
 0x375   : > { %v641_v47 = vpop.xlane.xlu0 %640 }
 0x376   : > { %v642_v48 = vsub.f32 %v631_v41, %v641_v47 }
 0x378   : > { %v643_v49 = vmul.f32 1.442695, %v642_v48 }
 0x37a   : > { %923 = vpow2.f32 %v643_v49 }
 0x37d   : > { %v653_v52 = vpop.permute.xlu0 %652 }
 0x37e   : > { %vm654_vm3 = vcmp.eq.s32.totalorder %v637_v38, %v653_v52 }
 0x37f   : > { %v655_v54 = vsel %vm654_vm3, %v631_v41, 0.0 }
 0x384   : > { %v924_v50 = vpop.eup %923 }
 0x385   : > { %v645_v51 = vsel %vm638_vm2, %v924_v50, 0.0 }
 0x386   : > { %646 = vadd.xlane.f32.xlu1 %v645_v51  ;;  %v660_v53 = vmul.f32 %v645_v51, %v631_v41 }
 0x38a   : > { %661 = vadd.xlane.f32.xlu1 %v660_v53 }
 0x38e   : > { %656 = vadd.xlane.f32.xlu1 %v655_v54 }
 0x392   : > { %669 = vadd.xlane.f32.xlu1 %v668_v55 }
 0x413   : > { %v647_v56 = vpop.xlane.xlu1 %646 }
 0x414   : > { %925 = vlog2.f32 %v647_v56 }
 0x415   : > { %927 = vrcp.f32 %v647_v56 }
 0x417   : > { %v662_v57 = vpop.xlane.xlu1 %661 }
 0x41b   : > { %v657_v61 = vpop.xlane.xlu1 %656 }
 0x41c   : > { %v658_v1 = vsub.f32 %v657_v61, %v641_v47 }
 0x41e   : > { %v926_v58 = vpop.eup %925 }
 0x41f   : > { %v928_v59 = vpop.eup %927  ;;  %v649_v60 = vmul.f32 0.6931472, %v926_v58  ;;  %v670_v4 = vpop.xlane.xlu1 %669 }
 0x420   : > { %v664_v63 = vmul.f32 %v928_v59, %v662_v57 }
 0x421   : > { %v665_v62 = vadd.f32 %v649_v60, %v641_v47  ;;  %v659_v2 = vsub.f32 %v658_v1, %v649_v60 }
 0x423   : > { %v666_v0 = vsub.f32 %v665_v62, %v664_v63 }
 0x425   : > { %v674_v3 = vsel %vm673_vm5, %v666_v0, 0.0 }
 0x426   : > { %v675_v5 = vsel %vm672_vm6, %v670_v4, %v674_v3 }
 0x427   : > { %v676_v6 = vsel %vm671_vm7, %v659_v2, %v675_v5 }
 0x428   : > { %678 = vst.msk [vmem:[%s347_s15] sm:$0xff] %vm677_vm8, %v676_v6 }
 0x429 PF: > { %s20_s27 = sadd.s32 1, %s999_s27  }
 0x42a   : > { %p17_p5 = scmp.ge.s32.totalorder %s20_s27, 4  }
 0x42c   :  { %19 = sbr.rel (!%p17_p5) target bundleno = 2 (0x2), region = 94 }
 0x433   :  { %698 = vsyncpa [#allocation3], 1 }
 0x434   :  { %700 = vsyncpa [#allocation3 + $0x1], 1 }
 0x435   :  { %701 = vsyncpa [#allocation5], 1 }

</bundles_post_ra>
